<compile_context>
chip_gen: v7x
topology: tpu7x:2x2x1
jax: 0.10.0
libtpu: 0.0.40
codegen_flags: <defaults>
</compile_context>

<pallas_src>
import functools
import math

import jax
import jax.numpy as jnp
import numpy as np
from jax.experimental import pallas as pl
from jax.experimental.pallas import tpu as pltpu


# ----------------------------- Pallas kernel ------------------------------- #
def _expand_pos_embed_kernel(left_ref, right_ref, out_ref, *, c: int):
    """Write `c` whole p1-blocks (c * grid_size rows) of the sincos table.

    left_ref : (gs, dim)     [sin(p0*w)|cos(p0*w)|0|0] for p0 = 0..gs-1 (kept
                             resident in VMEM: its block index never changes)
    right_ref: (1, c, dim)   [0|0|sin(p1*w)|cos(p1*w)] for this tile's c p1's
    out_ref  : (c, gs, dim)  out[b, p0, :] = left[p0] + right[b]

    The two inputs have disjoint non-zero columns, so the add is exact, and
    each store is a single full-width write (lane-dense when dim % 128 == 0).
    No transcendentals and no index math in the kernel.
    """
    left = left_ref[...]                    # (gs, dim)
    rows = right_ref[0]                     # (c, dim)
    for b in range(c):                      # static unroll; c | grid_size, small
        out_ref[b] = (left + rows[b:b + 1, :]).astype(out_ref.dtype)


# ----------------------------- tiling chooser ------------------------------ #
def _choose_blocks_per_tile(grid_size: int, dim: int, itemsize: int,
                            vmem_budget_bytes: int = 20 << 20,
                            target_rows: int = 1024) -> int:
    """Number of whole p1-blocks (each grid_size rows) per output tile.

    Constraints:
      * c divides grid_size           -> no ragged tiles, no host slice copy
      * >= 2 tiles when grid_size>=2  -> both v7x TensorCores get work
      * double-buffered working set within a conservative VMEM budget
      * tile ~target_rows rows        -> amortize ~0.35us per-grid-step cost
    """
    gs = grid_size
    if gs <= 1:
        return 1
    # TODO(synk): if grid_size*dim itself ever exceeds the VMEM budget (not the
    # case for open_sora's gs=512, dim=1152), split p1-blocks across tiles too.
    best = 1
    for c in range(1, gs + 1):
        if gs % c != 0:
            continue
        if gs // c < 2:          # keep >= 2 grid steps for 2-core sharding
            break
        tile_bytes = c * gs * dim * itemsize
        needed = 2 * tile_bytes + 2 * gs * dim * itemsize + 2 * c * dim * itemsize
        if needed > vmem_budget_bytes:
            break
        best = c
        if c * gs >= target_rows:
            break
    return best


# ------------------------------ table builder ------------------------------ #
def _build_pos_embed_table(dim: int, grid_size: int,
                           dtype=jnp.float32) -> jax.Array:
    """Pallas equivalent of get_2d_sincos_pos_embed(dim, grid_size): (gs*gs, dim)."""
    assert dim % 4 == 0, "dim must be divisible by 4 for 2-D sincos embedding"
    gs = max(int(grid_size), 1)
    q = dim // 4

    # Host constants in float64 -- exactly the numpy reference math -- cast
    # once to the table dtype.  Only 2*gs*dim unique values exist.
    omega = 1.0 / (10000.0 ** (np.arange(q, dtype=np.float64) / float(q)))
    ang = np.arange(gs, dtype=np.float64)[:, None] * omega[None, :]       # (gs, q)
    z = np.zeros_like(ang)
    left_np = np.concatenate([np.sin(ang), np.cos(ang), z, z], axis=1)    # (gs, dim)
    right_np = np.concatenate([z, z, np.sin(ang), np.cos(ang)], axis=1)   # (gs, dim)

    itemsize = np.dtype(dtype).itemsize
    c = _choose_blocks_per_tile(gs, dim, itemsize)
    n_tiles = gs // c                       # exact: c | gs by construction

    left = jnp.asarray(left_np, dtype=dtype)                              # (gs, dim)
    right = jnp.asarray(right_np.reshape(n_tiles, c, dim), dtype=dtype)   # (n_tiles, c, dim)

    # Right-sized VMEM limit: double-buffered out tile + (double-buffered)
    # resident inputs + modest headroom.  Stays well under v7x's 64 MiB.
    tile_bytes = c * gs * dim * itemsize
    needed = 2 * tile_bytes + 2 * gs * dim * itemsize + 2 * c * dim * itemsize
    vmem_limit = int(min(64 << 20, max(16 << 20, needed + (4 << 20))))

    # NOTE: fully lane-dense stores need dim % 128 == 0 (true for real configs
    # such as dim=1152); smaller dims (like the test's dim=32) still run
    # correctly via masked partial stores.
    table3d = pl.pallas_call(
        functools.partial(_expand_pos_embed_kernel, c=c),
        out_shape=jax.ShapeDtypeStruct((gs, gs, dim), dtype),
        grid=(n_tiles,),
        in_specs=[
            pl.BlockSpec((gs, dim), lambda i: (0, 0)),       # left: VMEM-resident
            pl.BlockSpec((1, c, dim), lambda i: (i, 0, 0)),  # right rows for tile i
        ],
        out_specs=pl.BlockSpec((c, gs, dim), lambda i: (i, 0, 0)),
        compiler_params=pltpu.CompilerParams(
            dimension_semantics=("parallel",),   # shard tiles across v7x's 2 TCs
            vmem_limit_bytes=vmem_limit,
        ),
    )(left, right)

    # Collapse (gs, gs, dim) -> (gs*gs, dim): row-major leading-dim collapse is
    # a free metadata reshape (no HBM copy), unlike the old padded-slice path.
    return table3d.reshape(gs * gs, dim)


# --------------------------- Module equivalent ------------------------------ #
class PositionEmbedding:
    """JAX/Pallas port of open_sora PositionEmbedding."""

    # NOTE: default kept as in the PyTorch spec (262114 is likely a typo for
    # 262144 = 512**2, but ceil(sqrt(.)) yields 512 either way).
    def __init__(self, dim: int, max_position_embeddings: int = 262114,
                 dtype=jnp.float32):
        self.dim = dim
        self.max_position_embeddings = max_position_embeddings
        self.dtype = dtype                 # pass jnp.bfloat16 to halve HBM bytes
        self._last_slice = None            # single-entry cache: (seq_len, array)
        self._set_pos_embed_cache(max_position_embeddings)

    def _set_pos_embed_cache(self, seq_len: int):
        self.max_seq_len_cached = seq_len
        grid_size = math.ceil(seq_len ** 0.5)
        self.pos_embed_cache = _build_pos_embed_table(
            self.dim, grid_size, dtype=self.dtype)
        self._last_slice = None

    def __call__(self, x: jax.Array) -> jax.Array:
        seq_len = x.shape[1]
        if seq_len > self.max_seq_len_cached:
            self._set_pos_embed_cache(seq_len)
        if self._last_slice is None or self._last_slice[0] != seq_len:
            self._last_slice = (seq_len, self.pos_embed_cache[None, :seq_len])
        return self._last_slice[1]          # (1, seq_len, dim)


# ------------------------- numpy reference (check) -------------------------- #
def _ref_get_1d(embed_dim, pos):
    omega = np.arange(embed_dim // 2, dtype=np.float64)
    omega /= embed_dim / 2.0
    omega = 1.0 / 10000 ** omega
    pos = pos.reshape(-1)
    out = np.einsum("m,d->md", pos, omega)
    return np.concatenate([np.sin(out), np.cos(out)], axis=1)


def _ref_get_2d(embed_dim, grid_size):
    grid_h = np.arange(grid_size, dtype=np.float32)
    grid_w = np.arange(grid_size, dtype=np.float32)
    grid = np.meshgrid(grid_w, grid_h)
    grid = np.stack(grid, axis=0).reshape([2, 1, grid_size, grid_size])
    emb_h = _ref_get_1d(embed_dim // 2, grid[0])
    emb_w = _ref_get_1d(embed_dim // 2, grid[1])
    return np.concatenate([emb_h, emb_w], axis=1)


# ---------------------------------- main ------------------------------------ #
if __name__ == "__main__":
    key = jax.random.PRNGKey(0)

    # Small, forward-consistent shapes: x is (batch, seq_len, dim).
    batch, seq_len, dim = 2, 64, 32
    max_pos = 256  # -> grid_size = 16, cache has 256 rows >= seq_len

    x = jax.random.normal(key, (batch, seq_len, dim), dtype=jnp.float32)

    module = PositionEmbedding(dim, max_position_embeddings=max_pos)
    out = jax.block_until_ready(module(x))

    # Second call exercises the cached-slice path (no rebuild, no new copy).
    out2 = jax.block_until_ready(module(x))

    # Check against the exact numpy reference used by the PyTorch module.
    # Host blocks are float64 + in-kernel add-with-exact-zero, so this matches
    # the f32-cast reference to float32 rounding.
    ref = _ref_get_2d(dim, math.ceil(max_pos ** 0.5))[None, :seq_len]
    ref = ref.astype(np.float32)
    assert out.shape == (1, seq_len, dim), out.shape
    np.testing.assert_allclose(np.asarray(out), ref, atol=1e-6, rtol=1e-6)
    np.testing.assert_allclose(np.asarray(out2), ref, atol=1e-6, rtol=1e-6)

    print("KERNEL_OK")
</pallas_src>

<mosaic_0001>
module attributes {stable_mosaic.version = 11 : i64} {
  func.func @_expand_pos_embed_kernel(%arg0: i32, %arg1: memref<16x32xf32, #tpu.memory_space<vmem>>, %arg2: memref<1x8x32xf32, #tpu.memory_space<vmem>>, %arg3: memref<8x16x32xf32, #tpu.memory_space<vmem>>) attributes {dimension_semantics = [#tpu.dimension_semantics<parallel>], iteration_bounds = array<i64: 2>, scalar_prefetch = 0 : i64, scratch_operands = 0 : i64, tpu.core_type = #tpu.core_type<tc>, window_params = [{pipeline_mode = #tpu.pipeline_mode<synchronous>, transform_indices = @transform_0, window_bounds = array<i64: 16, 32>}, {transform_indices = @transform_1, window_bounds = array<i64: 1, 8, 32>}, {transform_indices = @transform_2, window_bounds = array<i64: 8, 16, 32>}]} {
    %c0 = arith.constant 0 : index
    %c0_0 = arith.constant 0 : index
    %0 = vector.load %arg1[%c0, %c0_0] : memref<16x32xf32, #tpu.memory_space<vmem>>, vector<16x32xf32>
    %c0_1 = arith.constant 0 : index
    %c0_2 = arith.constant 0 : index
    %c0_3 = arith.constant 0 : index
    %1 = vector.load %arg2[%c0_1, %c0_2, %c0_3] : memref<1x8x32xf32, #tpu.memory_space<vmem>>, vector<1x8x32xf32>
    %2 = vector.shape_cast %1 : vector<1x8x32xf32> to vector<8x32xf32>
    %3 = vector.extract_strided_slice %2 {offsets = [0, 0], sizes = [1, 32], strides = [1, 1]} : vector<8x32xf32> to vector<1x32xf32>
    %4 = vector.broadcast %3 : vector<1x32xf32> to vector<16x32xf32>
    %5 = arith.addf %0, %4 : vector<16x32xf32>
    %c0_4 = arith.constant 0 : index
    %c0_5 = arith.constant 0 : index
    %c0_6 = arith.constant 0 : index
    %6 = vector.load %arg3[%c0_4, %c0_5, %c0_6] : memref<8x16x32xf32, #tpu.memory_space<vmem>>, vector<1x16x32xf32>
    %7 = vector.shape_cast %6 : vector<1x16x32xf32> to vector<16x32xf32>
    %8 = vector.shape_cast %5 : vector<16x32xf32> to vector<1x16x32xf32>
    tpu.vector_store %arg3[%c0_4, %c0_5, %c0_6], %8 {strides = array<i32>} : memref<8x16x32xf32, #tpu.memory_space<vmem>>, vector<1x16x32xf32>,
    %9 = vector.extract_strided_slice %2 {offsets = [1, 0], sizes = [1, 32], strides = [1, 1]} : vector<8x32xf32> to vector<1x32xf32>
    %10 = vector.broadcast %9 : vector<1x32xf32> to vector<16x32xf32>
    %11 = arith.addf %0, %10 : vector<16x32xf32>
    %c1 = arith.constant 1 : index
    %c0_7 = arith.constant 0 : index
    %c0_8 = arith.constant 0 : index
    %12 = vector.load %arg3[%c1, %c0_7, %c0_8] : memref<8x16x32xf32, #tpu.memory_space<vmem>>, vector<1x16x32xf32>
    %13 = vector.shape_cast %12 : vector<1x16x32xf32> to vector<16x32xf32>
    %14 = vector.shape_cast %11 : vector<16x32xf32> to vector<1x16x32xf32>
    tpu.vector_store %arg3[%c1, %c0_7, %c0_8], %14 {strides = array<i32>} : memref<8x16x32xf32, #tpu.memory_space<vmem>>, vector<1x16x32xf32>,
    %15 = vector.extract_strided_slice %2 {offsets = [2, 0], sizes = [1, 32], strides = [1, 1]} : vector<8x32xf32> to vector<1x32xf32>
    %16 = vector.broadcast %15 : vector<1x32xf32> to vector<16x32xf32>
    %17 = arith.addf %0, %16 : vector<16x32xf32>
    %c2 = arith.constant 2 : index
    %c0_9 = arith.constant 0 : index
    %c0_10 = arith.constant 0 : index
    %18 = vector.load %arg3[%c2, %c0_9, %c0_10] : memref<8x16x32xf32, #tpu.memory_space<vmem>>, vector<1x16x32xf32>
    %19 = vector.shape_cast %18 : vector<1x16x32xf32> to vector<16x32xf32>
    %20 = vector.shape_cast %17 : vector<16x32xf32> to vector<1x16x32xf32>
    tpu.vector_store %arg3[%c2, %c0_9, %c0_10], %20 {strides = array<i32>} : memref<8x16x32xf32, #tpu.memory_space<vmem>>, vector<1x16x32xf32>,
    %21 = vector.extract_strided_slice %2 {offsets = [3, 0], sizes = [1, 32], strides = [1, 1]} : vector<8x32xf32> to vector<1x32xf32>
    %22 = vector.broadcast %21 : vector<1x32xf32> to vector<16x32xf32>
    %23 = arith.addf %0, %22 : vector<16x32xf32>
    %c3 = arith.constant 3 : index
    %c0_11 = arith.constant 0 : index
    %c0_12 = arith.constant 0 : index
    %24 = vector.load %arg3[%c3, %c0_11, %c0_12] : memref<8x16x32xf32, #tpu.memory_space<vmem>>, vector<1x16x32xf32>
    %25 = vector.shape_cast %24 : vector<1x16x32xf32> to vector<16x32xf32>
    %26 = vector.shape_cast %23 : vector<16x32xf32> to vector<1x16x32xf32>
    tpu.vector_store %arg3[%c3, %c0_11, %c0_12], %26 {strides = array<i32>} : memref<8x16x32xf32, #tpu.memory_space<vmem>>, vector<1x16x32xf32>,
    %27 = vector.extract_strided_slice %2 {offsets = [4, 0], sizes = [1, 32], strides = [1, 1]} : vector<8x32xf32> to vector<1x32xf32>
    %28 = vector.broadcast %27 : vector<1x32xf32> to vector<16x32xf32>
    %29 = arith.addf %0, %28 : vector<16x32xf32>
    %c4 = arith.constant 4 : index
    %c0_13 = arith.constant 0 : index
    %c0_14 = arith.constant 0 : index
    %30 = vector.load %arg3[%c4, %c0_13, %c0_14] : memref<8x16x32xf32, #tpu.memory_space<vmem>>, vector<1x16x32xf32>
    %31 = vector.shape_cast %30 : vector<1x16x32xf32> to vector<16x32xf32>
    %32 = vector.shape_cast %29 : vector<16x32xf32> to vector<1x16x32xf32>
    tpu.vector_store %arg3[%c4, %c0_13, %c0_14], %32 {strides = array<i32>} : memref<8x16x32xf32, #tpu.memory_space<vmem>>, vector<1x16x32xf32>,
    %33 = vector.extract_strided_slice %2 {offsets = [5, 0], sizes = [1, 32], strides = [1, 1]} : vector<8x32xf32> to vector<1x32xf32>
    %34 = vector.broadcast %33 : vector<1x32xf32> to vector<16x32xf32>
    %35 = arith.addf %0, %34 : vector<16x32xf32>
    %c5 = arith.constant 5 : index
    %c0_15 = arith.constant 0 : index
    %c0_16 = arith.constant 0 : index
    %36 = vector.load %arg3[%c5, %c0_15, %c0_16] : memref<8x16x32xf32, #tpu.memory_space<vmem>>, vector<1x16x32xf32>
    %37 = vector.shape_cast %36 : vector<1x16x32xf32> to vector<16x32xf32>
    %38 = vector.shape_cast %35 : vector<16x32xf32> to vector<1x16x32xf32>
    tpu.vector_store %arg3[%c5, %c0_15, %c0_16], %38 {strides = array<i32>} : memref<8x16x32xf32, #tpu.memory_space<vmem>>, vector<1x16x32xf32>,
    %39 = vector.extract_strided_slice %2 {offsets = [6, 0], sizes = [1, 32], strides = [1, 1]} : vector<8x32xf32> to vector<1x32xf32>
    %40 = vector.broadcast %39 : vector<1x32xf32> to vector<16x32xf32>
    %41 = arith.addf %0, %40 : vector<16x32xf32>
    %c6 = arith.constant 6 : index
    %c0_17 = arith.constant 0 : index
    %c0_18 = arith.constant 0 : index
    %42 = vector.load %arg3[%c6, %c0_17, %c0_18] : memref<8x16x32xf32, #tpu.memory_space<vmem>>, vector<1x16x32xf32>
    %43 = vector.shape_cast %42 : vector<1x16x32xf32> to vector<16x32xf32>
    %44 = vector.shape_cast %41 : vector<16x32xf32> to vector<1x16x32xf32>
    tpu.vector_store %arg3[%c6, %c0_17, %c0_18], %44 {strides = array<i32>} : memref<8x16x32xf32, #tpu.memory_space<vmem>>, vector<1x16x32xf32>,
    %45 = vector.extract_strided_slice %2 {offsets = [7, 0], sizes = [1, 32], strides = [1, 1]} : vector<8x32xf32> to vector<1x32xf32>
    %46 = vector.broadcast %45 : vector<1x32xf32> to vector<16x32xf32>
    %47 = arith.addf %0, %46 : vector<16x32xf32>
    %c7 = arith.constant 7 : index
    %c0_19 = arith.constant 0 : index
    %c0_20 = arith.constant 0 : index
    %48 = vector.load %arg3[%c7, %c0_19, %c0_20] : memref<8x16x32xf32, #tpu.memory_space<vmem>>, vector<1x16x32xf32>
    %49 = vector.shape_cast %48 : vector<1x16x32xf32> to vector<16x32xf32>
    %50 = vector.shape_cast %47 : vector<16x32xf32> to vector<1x16x32xf32>
    tpu.vector_store %arg3[%c7, %c0_19, %c0_20], %50 {strides = array<i32>} : memref<8x16x32xf32, #tpu.memory_space<vmem>>, vector<1x16x32xf32>,
    return
  }
  func.func @transform_0(%arg0: i32) -> (i32, i32) {
    %c0_i32 = arith.constant 0 : i32
    %c0_i32_0 = arith.constant 0 : i32
    %c0_i32_1 = arith.constant 0 : i32
    return %c0_i32, %c0_i32_0 : i32, i32
  }
  func.func @transform_1(%arg0: i32) -> (i32, i32, i32) {
    %c0_i32 = arith.constant 0 : i32
    %c0_i32_0 = arith.constant 0 : i32
    %c0_i32_1 = arith.constant 0 : i32
    return %arg0, %c0_i32, %c0_i32_0 : i32, i32, i32
  }
  func.func @transform_2(%arg0: i32) -> (i32, i32, i32) {
    %c0_i32 = arith.constant 0 : i32
    %c0_i32_0 = arith.constant 0 : i32
    %c0_i32_1 = arith.constant 0 : i32
    return %arg0, %c0_i32, %c0_i32_0 : i32, i32, i32
  }
}

</mosaic_0001>

<bundles_post_ra>
// kernel: tpu_custom_call.1
= control target key start
LH: loop header
LB: loop body
LE: loop exit
PB: predicated region body
PF: predicated region fallthrough
CT: control target
= control target key end

     0   :  { %7 = vsyncpa [#allocation3], 0  ;;  %s829_s0 = inlined_call_operand.hbm [shape: f32[16,32], index: 0, kind: input, shape index: {}]   ;;  %s830_s1 = inlined_call_operand.hbm [shape: f32[2,8,32], index: 1, kind: input, shape index: {}]   ;;  %s831_s2 = inlined_call_operand.hbm [shape: f32[16,16,32], index: 2, kind: output, shape index: {}]  }
   0x1   :  { %8 = vsyncpa [#allocation6], 0 }
   0x2   :  { %10 = vsyncpa [#allocation6 + $0x1], 0 }
   0x3   :  { %11 = vsyncpa [#allocation4], 0 }
   0x4   :  { %13 = vsyncpa [#allocation4 + $0x1], 0  ;;  %s595_s9 = smov 0   ;;  %s597_s10 = smov 0  }
   0x5   :  { %s599_s11 = smov 0   ;;  %s601_s12 = smov 0  }
   0x6 LB: > { %s616_s13 = sadd.s32 4294967295, %s571_s12   ;;  %s350_s14 = sadd.s32 4294967294, %s571_s12   ;;  %s571_s12 = sphi %s601_s12, %s851_s12   ;;  %s567_s11 = sphi %s599_s11, %s850_s11   ;;  %s563_s10 = sphi %s597_s10, %s849_s10   ;;  %s559_s9 = sphi %s595_s9, %s848_s9  }
   0x7   : > { %p60_p0 = scmp.ne.s32.totalorder %s563_s10, %s559_s9  ;;  %p832_p1 = scmp.eq.s32.totalorder %s616_s13, 0 }
   0x8   : > { %p90_p3 = scmp.eq.s32.totalorder %s350_s14, 1  ;;  %p351_p5 = scmp.ge.s32.totalorder %s571_s12, 1 }
   0x9   : > { %p625_p4 = por %p832_p1, %p60_p0  ;;  %p97_p7 = scmp.lt.s32.totalorder %s571_s12, 3 }
   0xa   : > { %p630_p6 = por %p90_p3, %p60_p0  ;;  %s573_s18 = smov [#allocation2]  }
   0xb   : > { %s835_s15 = scalar_select %p625_p4, 1, 0 }
   0xc   : > { %s836_s16 = scalar_select %p630_p6, 1, 0 }
   0xd   : > { %p635_p8 = pnand %p351_p5, %p97_p7  ;;  %s109_s19 = sshll.u32 %s573_s18, 4  ;;  %s639_s19 = int_to_ptr.vmem [resolvable:$true] %s109_s19 }
   0xe   : > { %s651_s21 = sadd.s32 1, %s571_s12   ;;  %s47_s22 = sadd.s32 1, %s567_s11 }
   0xf   : > { %s837_s17 = scalar_select %p635_p8, 1, 0 }
  0x10   : > { %p390_p9 = pneg %p635_p8  ;;  %s44_s23 = ssub.s32 %s571_s12, %s651_s21 }
  0x11   : > { %s443_s26 = scalar_lea.hbm %s829_s0, 256 }
  0x12   : > { %p646_p11 = pnand %p390_p9, %p832_p1  ;;  %p444_p12 = scmp.ne.s32.totalorder %s829_s0, %s443_s26 }
  0x13   : > { %p450_p5 = scmp.lt.u32.totalorder %s443_s26, %s829_s0 }
  0x14   : > { %p445_p13 = pneg %p646_p11 }
  0x16   : > { %p446_p0 = pnand %p445_p13, %p444_p12 }
  0x18   : > { %p447_p3 = pneg %p446_p0 }
  0x1a   : > { %p452_p7 = pnand %p450_p5, %p447_p3 }
  0x1c   : > { %455 = shalt.err (!%p452_p7)
}
  0x1d   : > { %s456_s3 = scalar_lea.vmem %s639_s19, 256  ;;  %p464_p2 = scmp.lt.s32.totalorder %s639_s19, %s639_s19 }
  0x1e   : > { %p457_p9 = scmp.ne.s32.totalorder %s639_s19, %s456_s3  ;;  %p465_p6 = scmp.lt.s32.totalorder %s456_s3, %s456_s3 }
  0x20   : > { %p459_p10 = pnand %p457_p9, %p445_p13  ;;  %p466_p4 = por %p465_p6, %p464_p2 }
  0x22   : > { %p460_p1 = pneg %p459_p10 }
  0x24   : > { %p467_p8 = pnand %p466_p4, %p460_p1 }
  0x26   : > { %470 = shalt.err (!%p467_p8)
}
  0x27   : > { %s574_s4 = smov 128   ;;  %s575_s5 = smov 8  }
  0x28   : > { %393 = dma.hbm_to_vmem [thread:$0]  (!%p646_p11), %s829_s0, 256, %s639_s19, [#allocation3], %s574_s4, %s574_s4, %s575_s5  }
  0x29   : > { %p45_p2 = scmp.eq.s32.totalorder %s44_s23, 0  ;;  %p54_p1 = scmp.ne.s32.totalorder %s567_s11, %s563_s10 }
  0x2a   : > { %p55_p4 = scmp.eq.s32.totalorder %s571_s12, 0  ;;  %p403_p6 = scmp.lt.s32.totalorder %s571_s12, 2 }
  0x2b   : > { %s682_s8 = scalar_select %p45_p2, %s567_s11, %s47_s22  }
  0x2c   : > { %p56_p8 = por %p55_p4, %p54_p1  ;;  %p839_p10 = scmp.eq.s32.totalorder %s616_s13, 1 }
  0x2d   : > { %s123_s18 = sand.u32 1, %s567_s11   ;;  %s355_s24 = sshll.u32 %s571_s12, 7 }
  0x2e   : > { %p686_p12 = por %p839_p10, %p54_p1  ;;  %s354_s25 = sshll.u32 %s123_s18, 3 }
  0x2f   : > { %s695_s27 = scalar_lea.hbm %s830_s1, %s355_s24  ;;  %s127_s19 = scalar_lea.vmem [#allocation5], %s354_s25 }
  0x30   : > { %s134_s22 = sshll.u32 %s127_s19, 4  ;;  %p697_p11 = pnand %p403_p6, %p56_p8  ;;  %s701_s22 = int_to_ptr.vmem [resolvable:$true] %s134_s22 }
  0x31   : > { %s124_s28 = scalar_lea.sflag [#allocation6], %s123_s18  ;;  %s471_s29 = scalar_lea.hbm %s695_s27, 128 }
  0x32   : > { %p472_p13 = scmp.ne.s32.totalorder %s695_s27, %s471_s29  ;;  %p473_p0 = pneg %p697_p11 }
  0x33   : > { %s476_s4 = scalar_lea.hbm %s830_s1, 256  ;;  %p477_p7 = scmp.lt.u32.totalorder %s695_s27, %s830_s1 }
  0x34   : > { %p474_p3 = pnand %p473_p0, %p472_p13  ;;  %p478_p9 = scmp.lt.u32.totalorder %s476_s4, %s471_s29 }
  0x35   : > { %p480_p1 = scmp.lt.u32.totalorder %s471_s29, %s695_s27 }
  0x36   : > { %p475_p5 = pneg %p474_p3  ;;  %p479_p2 = por %p478_p9, %p477_p7 }
  0x38   : > { %p481_p4 = por %p480_p1, %p479_p2 }
  0x3a   : > { %p482_p6 = pnand %p481_p4, %p475_p5 }
  0x3c   : > { %485 = shalt.err (!%p482_p6)
}
  0x3d   : > { %s486_s7 = scalar_lea.vmem %s701_s22, 128  ;;  %s576_s18 = smov [#allocation5]  }
  0x3e   : > { %p487_p8 = scmp.ne.s32.totalorder %s701_s22, %s486_s7  ;;  %s491_s24 = sshll.u32 %s576_s18, 4  ;;  %s492_s24 = int_to_ptr.vmem [resolvable:$false] %s491_s24 }
  0x3f   : > { %s493_s25 = scalar_lea.vmem %s492_s24, 256  ;;  %p494_p3 = scmp.lt.s32.totalorder %s701_s22, %s492_s24 }
  0x40   : > { %p489_p10 = pnand %p487_p8, %p473_p0  ;;  %p495_p7 = scmp.lt.s32.totalorder %s493_s25, %s486_s7 }
  0x42   : > { %p490_p13 = pneg %p489_p10  ;;  %p496_p9 = por %p495_p7, %p494_p3 }
  0x44   : > { %p497_p2 = pnand %p496_p9, %p490_p13 }
  0x46   : > { %500 = shalt.err (!%p497_p2)
}
  0x47   : > { %397 = dma.hbm_to_vmem [thread:$0]  (!%p697_p11), %s695_s27, 128, %s701_s22, %s124_s28  }
  0x48   : > { %p842_p5 = scmp.ne.s32.totalorder %s837_s17, 0 }
  0x49   : > { %p843_p0 = scmp.eq.s32.totalorder (!%p842_p5), %s616_s13, 0 }
  0x4a   : > { %143 = sbr.rel (%p842_p5) target bundleno = 118 (0x76), region = 28 }
  0x51   : > { %546 = dma.done.wait (%p843_p0), [#allocation3], 256   ;;  %p844_p1 = pmov %p843_p0 }
  0x52   : > { %s735_s20 = sand.u32 1, %s563_s10   ;;  %p845_p4 = scmp.ne.s32.totalorder %s835_s15, 0 }
  0x53   : > { %548 = vsyncadd (%p844_p1), [#allocation3], 4294967040  ;;  %s358_s26 = sshll.u32 %s735_s20, 3  ;;  %s150_s19 = scalar_lea.sflag [#allocation6], %s735_s20 }
  0x54   : > { %s153_s23 = scalar_lea.vmem [#allocation5], %s358_s26 }
  0x55   : > { %550 = dma.done.wait (%p845_p4), %s150_s19, 128  }
  0x56   : > { %552 = vsyncadd (%p845_p4), %s150_s19, 4294967168  ;;  %v178_v0 = vlaneseq  ;;  %s359_s17 = sshll.u32 %s735_s20, 7  ;;  %v175_v10 = vld [vmem:[#allocation2] sm:$0xff]  ;;  %v177_v11 = vld [vmem:[%s153_s23] sm:$0xff]  ;;  %vm184_vm0 = vcmask 261120   ;;  %s381_s15 = sshll.u32 %s616_s13, 11 }
  0x57   : > { %v176_v12 = vld [vmem:[#allocation2 + $0x8] sm:$0xff]  ;;  %s745_s27 = scalar_lea.vmem [#allocation7], %s359_s17  ;;  %s759_s29 = scalar_lea.hbm %s831_s2, %s381_s15 }
  0x58   : > { %v179_v1 = vshrl.u32 %v178_v0, 7  ;;  %s265_s22 = sshll.u32 %s745_s27, 4  ;;  %s251_s30 = scalar_lea.sflag [#allocation4], %s735_s20  ;;  %s761_s22 = int_to_ptr.vmem [resolvable:$true] %s265_s22 }
  0x59   : > { %s501_s3 = scalar_lea.vmem %s761_s22, 2048  ;;  %s577_s4 = smov [#allocation7]  }
  0x5a   : > { %v180_v2 = vsub.s32 0, %v179_v1  ;;  %v189_v3 = vsub.s32 1, %v179_v1  ;;  %v198_v4 = vsub.s32 2, %v179_v1  ;;  %v207_v5 = vsub.s32 3, %v179_v1  ;;  %p502_p11 = scmp.ne.s32.totalorder %s761_s22, %s501_s3  ;;  %s505_s5 = sshll.u32 %s577_s4, 4  ;;  %s506_s5 = int_to_ptr.vmem [resolvable:$false] %s505_s5 }
  0x5b   : > { %v216_v6 = vsub.s32 4, %v179_v1  ;;  %v225_v7 = vsub.s32 5, %v179_v1  ;;  %v234_v8 = vsub.s32 6, %v179_v1  ;;  %v243_v9 = vsub.s32 7, %v179_v1  ;;  %s507_s6 = scalar_lea.vmem %s506_s5, 4096  ;;  %p508_p10 = scmp.lt.s32.totalorder %s761_s22, %s506_s5 }
  0x5c   : > { %v181_v13 = vrot.slane %v177_v11, %v180_v2  ;;  %v190_v14 = vrot.slane %v177_v11, %v189_v3  ;;  %v199_v15 = vrot.slane %v177_v11, %v198_v4  ;;  %v208_v16 = vrot.slane %v177_v11, %v207_v5  ;;  %p503_p6 = pnand %p502_p11, %p686_p12  ;;  %p509_p13 = scmp.lt.s32.totalorder %s507_s6, %s501_s3 }
  0x5d   : > { %v217_v17 = vrot.slane %v177_v11, %v216_v6  ;;  %v226_v18 = vrot.slane %v177_v11, %v225_v7  ;;  %v235_v19 = vrot.slane %v177_v11, %v234_v8  ;;  %v244_v20 = vrot.slane %v177_v11, %v243_v9 }
  0x5e   : > { %v182_v21 = vadd.f32 %v181_v13, %v175_v10  ;;  %v183_v22 = vadd.f32 %v181_v13, %v176_v12  ;;  %v191_v23 = vadd.f32 %v190_v14, %v175_v10  ;;  %v192_v24 = vadd.f32 %v190_v14, %v176_v12  ;;  %p504_p8 = pneg %p503_p6  ;;  %p510_p3 = por %p509_p13, %p508_p10 }
  0x5f   : > { %v200_v25 = vadd.f32 %v199_v15, %v175_v10  ;;  %v201_v26 = vadd.f32 %v199_v15, %v176_v12  ;;  %v209_v27 = vadd.f32 %v208_v16, %v175_v10  ;;  %v210_v28 = vadd.f32 %v208_v16, %v176_v12 }
  0x60   : > { %185 = vst.msk [vmem:[%s745_s27] sm:$0xff] %vm184_vm0, %v182_v21  ;;  %186 = vst.msk [vmem:[%s745_s27 + $0x8] sm:$0xff] %vm184_vm0, %v183_v22  ;;  %v218_v29 = vadd.f32 %v217_v17, %v175_v10  ;;  %v219_v30 = vadd.f32 %v217_v17, %v176_v12  ;;  %v227_v31 = vadd.f32 %v226_v18, %v175_v10  ;;  %p511_p7 = pnand %p510_p3, %p504_p8 }
  0x61   : > { %360 = vst.msk [vmem:[%s745_s27 + $0x10] sm:$0xff] %vm184_vm0, %v191_v23  ;;  %361 = vst.msk [vmem:[%s745_s27 + $0x18] sm:$0xff] %vm184_vm0, %v192_v24  ;;  %v228_v32 = vadd.f32 %v226_v18, %v176_v12  ;;  %v236_v33 = vadd.f32 %v235_v19, %v175_v10  ;;  %v237_v34 = vadd.f32 %v235_v19, %v176_v12 }
  0x62   : > { %362 = vst.msk [vmem:[%s745_s27 + $0x20] sm:$0xff] %vm184_vm0, %v200_v25  ;;  %363 = vst.msk [vmem:[%s745_s27 + $0x28] sm:$0xff] %vm184_vm0, %v201_v26  ;;  %v245_v35 = vadd.f32 %v244_v20, %v175_v10  ;;  %v246_v36 = vadd.f32 %v244_v20, %v176_v12 }
  0x63   : > { %364 = vst.msk [vmem:[%s745_s27 + $0x30] sm:$0xff] %vm184_vm0, %v209_v27  ;;  %365 = vst.msk [vmem:[%s745_s27 + $0x38] sm:$0xff] %vm184_vm0, %v210_v28 }
  0x64   : > { %366 = vst.msk [vmem:[%s745_s27 + $0x40] sm:$0xff] %vm184_vm0, %v218_v29  ;;  %367 = vst.msk [vmem:[%s745_s27 + $0x48] sm:$0xff] %vm184_vm0, %v219_v30 }
  0x65   : > { %368 = vst.msk [vmem:[%s745_s27 + $0x50] sm:$0xff] %vm184_vm0, %v227_v31  ;;  %369 = vst.msk [vmem:[%s745_s27 + $0x58] sm:$0xff] %vm184_vm0, %v228_v32 }
  0x66   : > { %370 = vst.msk [vmem:[%s745_s27 + $0x60] sm:$0xff] %vm184_vm0, %v236_v33  ;;  %371 = vst.msk [vmem:[%s745_s27 + $0x68] sm:$0xff] %vm184_vm0, %v237_v34 }
  0x67   : > { %372 = vst.msk [vmem:[%s745_s27 + $0x70] sm:$0xff] %vm184_vm0, %v245_v35  ;;  %373 = vst.msk [vmem:[%s745_s27 + $0x78] sm:$0xff] %vm184_vm0, %v246_v36 }
  0x68   : > { %514 = shalt.err (!%p511_p7)
}
  0x69   : > { %s515_s7 = scalar_lea.hbm %s759_s29, 2048  ;;  %s519_s25 = scalar_lea.hbm %s831_s2, 4096 }
  0x6a   : > { %p516_p9 = scmp.ne.s32.totalorder %s759_s29, %s515_s7  ;;  %p520_p0 = scmp.lt.u32.totalorder %s759_s29, %s831_s2 }
  0x6b   : > { %p521_p1 = scmp.lt.u32.totalorder %s519_s25, %s515_s7  ;;  %p523_p11 = scmp.lt.u32.totalorder %s515_s7, %s759_s29 }
  0x6c   : > { %p517_p2 = pnand %p516_p9, %p686_p12 }
  0x6d   : > { %p522_p4 = por %p521_p1, %p520_p0 }
  0x6e   : > { %p518_p5 = pneg %p517_p2 }
  0x6f   : > { %p524_p6 = por %p523_p11, %p522_p4 }
  0x71   : > { %p525_p8 = pnand %p524_p6, %p518_p5 }
  0x73   : > { %528 = shalt.err (!%p525_p8)
}
  0x74   : > { %s578_s23 = smov 128   ;;  %s579_s17 = smov 8  }
  0x75   : > { %388 = dma.vmem_to_hbm [thread:$0]  (%p686_p12), %s761_s22, 2048, %s759_s29, %s251_s30, %s578_s23, %s578_s23, %s579_s17  }
  0x76 PF: > { %s280_s15 = sand.u32 1, %s559_s9   ;;  %p846_p10 = scmp.ne.s32.totalorder %s836_s16, 0 }
  0x77   : > { %p847_p13 = scmp.ge.s32.totalorder %s571_s12, 2  ;;  %s281_s27 = scalar_lea.sflag [#allocation4], %s280_s15 }
  0x79   : > { %p399_p3 = pnand %p847_p13, %p846_p10 }
  0x7b   : > { %554 = dma.done.wait (!%p399_p3), %s281_s27, 2048  }
  0x7c   : > { %556 = vsyncadd (!%p399_p3), %s281_s27, 4294965248  ;;  %p16_p7 = scmp.ge.s32.totalorder %s651_s21, 4   ;;  %s848_s9 = smov %s563_s10 }
  0x7d   : > { %s849_s10 = smov %s567_s11  ;;  %s850_s11 = smov %s682_s8 }
  0x7e   : > { %s851_s12 = smov %s651_s21  ;;  %18 = sbr.rel (!%p16_p7) target bundleno = 6 (0x6), region = 85 }
  0x85   :  { %286 = vsyncpa [#allocation3], 1 }
  0x86   :  { %288 = vsyncpa [#allocation3 + $0x1], 1 }
  0x87   :  { %289 = vsyncpa [#allocation6], 1 }
  0x88   :  { %291 = vsyncpa [#allocation6 + $0x1], 1 }
  0x89   :  { %292 = vsyncpa [#allocation4], 1 }
  0x8a   :  { %294 = vsyncpa [#allocation4 + $0x1], 1 }

</bundles_post_ra>
